<compile_context>
chip_gen: v6e
topology: v6e:2x2x1
jax: 0.10.0
libtpu: 0.0.40
codegen_flags: <defaults>
</compile_context>

<pallas_src>
import functools

import jax
import jax.numpy as jnp
from jax.experimental import pallas as pl
from jax.experimental.pallas import tpu as pltpu


MODULES = [
    ("conv1", "conv"),
    ("relu1", "relu"),
    ("drop1", "skip"),   # present in the submodule but not extracted -> skipped
    ("pool1", "pool"),
    ("conv2", "conv"),
    ("relu2", "relu"),
]
EXTRACTED_LAYERS = ["conv1", "relu1", "pool1", "conv2", "relu2"]


# ----------------------------------------------------------------------------
# Small in-kernel integer helpers (shift/and when divisor is a power of two,
# so the common case never relies on vector integer div/rem lowering).
# ----------------------------------------------------------------------------

def _is_pow2(c):
    return c > 0 and (c & (c - 1)) == 0


def _idiv(x, c):
    if _is_pow2(c):
        return x >> (int(c).bit_length() - 1)
    return x // c            # fallback (untested path for non-pow2 widths)


def _imod(x, c):
    if _is_pow2(c):
        return x & (c - 1)
    return x % c             # fallback (untested path for non-pow2 widths)


def _edge_masks(m, w_row):
    """{0,1} masks killing the flat-row wrap of the W-boundary taps."""
    col = _imod(jax.lax.broadcasted_iota(jnp.int32, (1, m), 1), w_row)
    left = (col != 0).astype(jnp.float32)            # for kw == 0 taps
    right = (col != w_row - 1).astype(jnp.float32)   # for kw == 2 taps
    return left, right


def _pool_select_matrix(m1, m2, w, wp):
    """One-hot [m1, m2]: picks the 2x2-pool anchor (2ho, 2wo) for output j."""
    row = jax.lax.broadcasted_iota(jnp.int32, (m1, m2), 0)
    col = jax.lax.broadcasted_iota(jnp.int32, (m1, m2), 1)
    anchor = _idiv(col, wp) * (2 * w) + _imod(col, wp) * 2
    return (row == anchor).astype(jnp.float32)


# ----------------------------------------------------------------------------
# Fused Pallas kernel: conv1 -> relu1 -> pool1 -> conv2 -> relu2
# ----------------------------------------------------------------------------

def _conv3x3(xpad, wcat, bias, left_m, right_m, w_row, m):
    """out[Cout, m] = Wcat[Cout, 9*Cin] @ Xcat[9*Cin, m] + bias.

    xpad: [Cin, (rows+2)*w_row + 2] zero-row-padded flat activation with one
    guard element front/back. Each 3x3 tap is the constant-lane-offset slice
    xpad[:, kh*w_row+kw : +m]; kw=0 / kw=2 taps are masked to emulate zero
    padding along W (the flat layout would wrap rows otherwise). The 9 masked
    slices are concatenated along sublanes so the conv is a single MXU matmul.
    """
    taps = []
    for kh in range(3):
        for kw in range(3):
            s = kh * w_row + kw
            xs = xpad[:, s:s + m]                     # [Cin, m]
            if kw == 0:
                xs = xs * left_m
            elif kw == 2:
                xs = xs * right_m
            taps.append(xs)
    xcat = jnp.concatenate(taps, axis=0)              # [9*Cin, m]
    return jnp.dot(wcat, xcat, preferred_element_type=jnp.float32) + bias


def _fused_chain_kernel(x_ref, w1_ref, b1_ref, w2_ref, b2_ref,
                        conv1_ref, relu1_ref, pool1_ref, conv2_ref, relu2_ref,
                        *, H, W, B):
    Hp, Wp = H // 2, W // 2
    M1, M2 = H * W, Hp * Wp
    Cin = x_ref.shape[1]
    C1 = conv1_ref.shape[1]

    # In-kernel constants (VPU iota + compare): no HBM traffic, no quadratic
    # `sel` input, no extra BlockSpecs. Hoisted above the per-image loop.
    lm1, rm1 = _edge_masks(M1, W)
    lm2, rm2 = _edge_masks(M2, Wp)
    sel = _pool_select_matrix(M1, M2, W, Wp)

    w1 = w1_ref[...]
    b1 = b1_ref[...]
    w2 = w2_ref[...]
    b2 = b2_ref[...]

    for b in range(B):                                # static unroll over block
        # ---- conv1 (zero row padding + guards built in-registers) ----------
        x = x_ref[b]                                  # [Cin, M1]
        zr1 = jnp.zeros((Cin, W + 1), jnp.float32)
        xpad1 = jnp.concatenate([zr1, x, zr1], axis=1)        # [Cin, M1+2W+2]
        acc1 = _conv3x3(xpad1, w1, b1, lm1, rm1, W, M1)       # [C1, M1]
        conv1_ref[b] = acc1

        # ---- relu1 (fused epilogue) -----------------------------------------
        relu1 = jnp.maximum(acc1, 0.0)
        relu1_ref[b] = relu1

        # ---- pool1: 2x2 stride-2 max pool on the flat [C1, M1] map ----------
        # Window max via shifted slices (only even (h,w) anchors are ever
        # selected, so the row-wrap junk never matters), then compaction as a
        # one-hot matmul on the MXU using the in-kernel generated `sel`.
        ext = jnp.concatenate(
            [relu1, jnp.zeros((C1, W + 1), jnp.float32)], axis=1)
        win = jnp.maximum(jnp.maximum(ext[:, 0:M1], ext[:, 1:M1 + 1]),
                          jnp.maximum(ext[:, W:W + M1], ext[:, W + 1:W + 1 + M1]))
        pool1 = jnp.dot(win, sel, preferred_element_type=jnp.float32)  # [C1,M2]
        pool1_ref[b] = pool1

        # ---- conv2 (+ bias) on the pooled map --------------------------------
        zr2 = jnp.zeros((C1, Wp + 1), jnp.float32)
        xpad2 = jnp.concatenate([zr2, pool1, zr2], axis=1)    # [C1, M2+2Wp+2]
        acc2 = _conv3x3(xpad2, w2, b2, lm2, rm2, Wp, M2)      # [C2, M2]
        conv2_ref[b] = acc2

        # ---- relu2 (fused epilogue) -------------------------------------------
        relu2_ref[b] = jnp.maximum(acc2, 0.0)


# ----------------------------------------------------------------------------
# Wrapper (mirrors the torch FeatureExtractor loop; the extracted set is
# static, so the whole chain fuses into one pallas_call at trace time)
# ----------------------------------------------------------------------------

def _pick_block_batch(n, cap=32):
    """Images per grid step: keep >= 2 grid steps when n >= 2 (both v7x
    TensorCores get work), batch as many images as possible otherwise to
    amortize per-step overhead / merge output DMAs, cap the VMEM footprint."""
    if n < 2:
        return 1
    b = min(n // 2, cap)
    while b > 1 and n % b:
        b -= 1
    return b


@jax.jit
def feature_extractor_forward(x_nchw, params):
    """Returns [conv1, relu1, pool1, conv2, relu2] outputs (NCHW), mirroring the
    torch FeatureExtractor loop (drop1 is not extracted -> skipped).
    NOTE: the torch forward does print('name', name); omitted to keep stdout
    to exactly KERNEL_OK."""
    N, Cin, H, W = x_nchw.shape
    # TODO(synk): support odd H/W (PyTorch MaxPool2d(2) floors the pooled size).
    assert H % 2 == 0 and W % 2 == 0, "even spatial dims required for 2x2 pool"
    Hp, Wp = H // 2, W // 2
    M1, M2 = H * W, Hp * Wp

    w1, b1 = params["conv1"]["w"], params["conv1"]["b"]   # HWIO, [Cout]
    w2, b2 = params["conv2"]["w"], params["conv2"]["b"]
    C1, C2 = w1.shape[-1], w2.shape[-1]

    # NCHW -> [N, Cin, H*W]: contiguous reshape (no data movement). Zero-row
    # padding + guard elements are built inside the kernel.
    x_flat = x_nchw.reshape(N, Cin, M1)

    # [kh, kw, Cin, Cout] -> [Cout, 9*Cin]; K ordering = tap-major, Cin-minor,
    # matching the in-kernel Xcat concatenation -> one K=9*Cin MXU matmul.
    w1cat = jnp.transpose(w1, (3, 0, 1, 2)).reshape(C1, 9 * Cin)
    w2cat = jnp.transpose(w2, (3, 0, 1, 2)).reshape(C2, 9 * C1)
    b1c = b1.reshape(C1, 1)
    b2c = b2.reshape(C2, 1)

    B = _pick_block_batch(N)
    grid = (N // B,)

    flops = 2 * N * (9 * Cin * C1 * M1      # conv1
                     + C1 * M1 * M2         # pool compaction matmul
                     + 9 * C1 * C2 * M2)    # conv2
    bytes_accessed = 4 * (N * Cin * M1
                          + C1 * 9 * Cin + C1 + C2 * 9 * C1 + C2
                          + N * (2 * C1 * M1 + C1 * M2 + 2 * C2 * M2))

    kernel = functools.partial(_fused_chain_kernel, H=H, W=W, B=B)
    conv1, relu1, pool1, conv2, relu2 = pl.pallas_call(
        kernel,
        out_shape=(
            jax.ShapeDtypeStruct((N, C1, M1), jnp.float32),
            jax.ShapeDtypeStruct((N, C1, M1), jnp.float32),
            jax.ShapeDtypeStruct((N, C1, M2), jnp.float32),
            jax.ShapeDtypeStruct((N, C2, M2), jnp.float32),
            jax.ShapeDtypeStruct((N, C2, M2), jnp.float32),
        ),
        grid=grid,
        in_specs=[
            pl.BlockSpec((B, Cin, M1), lambda i: (i, 0, 0)),
            pl.BlockSpec((C1, 9 * Cin), lambda i: (0, 0)),
            pl.BlockSpec((C1, 1), lambda i: (0, 0)),
            pl.BlockSpec((C2, 9 * C1), lambda i: (0, 0)),
            pl.BlockSpec((C2, 1), lambda i: (0, 0)),
        ],
        out_specs=(
            pl.BlockSpec((B, C1, M1), lambda i: (i, 0, 0)),
            pl.BlockSpec((B, C1, M1), lambda i: (i, 0, 0)),
            pl.BlockSpec((B, C1, M2), lambda i: (i, 0, 0)),
            pl.BlockSpec((B, C2, M2), lambda i: (i, 0, 0)),
            pl.BlockSpec((B, C2, M2), lambda i: (i, 0, 0)),
        ),
        compiler_params=pltpu.CompilerParams(
            dimension_semantics=("parallel",)),
        cost_estimate=pl.CostEstimate(flops=flops, transcendentals=0,
                                      bytes_accessed=bytes_accessed),
    )(x_flat, w1cat, b1c, w2cat, b2c)

    # [N, C, H*W] -> NCHW (pure reshape of the minor dim: no data movement).
    # TODO(synk): pack two images' pooled maps along the lane axis to make the
    # 64-wide post-pool stage fully lane-dense (left out to keep the shifted-
    # slice conv layout simple; HBM writeback is already blocked over B images).
    return [
        conv1.reshape(N, C1, H, W),
        relu1.reshape(N, C1, H, W),
        pool1.reshape(N, C1, Hp, Wp),
        conv2.reshape(N, C2, Hp, Wp),
        relu2.reshape(N, C2, Hp, Wp),
    ]


# ----------------------------------------------------------------------------
# Plain-JAX reference for verification
# ----------------------------------------------------------------------------

def reference_forward(x_nchw, params):
    outs = []
    x = jnp.transpose(x_nchw, (0, 2, 3, 1))
    for name, kind in MODULES:
        if name not in EXTRACTED_LAYERS:
            continue
        if kind == "conv":
            x = jax.lax.conv_general_dilated(
                x, params[name]["w"], window_strides=(1, 1), padding="SAME",
                dimension_numbers=("NHWC", "HWIO", "NHWC"),
                precision=jax.lax.Precision.HIGHEST) + params[name]["b"]
        elif kind == "relu":
            x = jnp.maximum(x, 0.0)
        elif kind == "pool":
            x = jax.lax.reduce_window(x, -jnp.inf, jax.lax.max,
                                      (1, 2, 2, 1), (1, 2, 2, 1), "VALID")
        outs.append(jnp.transpose(x, (0, 3, 1, 2)))
    return outs


if __name__ == "__main__":
    key = jax.random.PRNGKey(0)
    kx, k1, k2, k3, k4 = jax.random.split(key, 5)

    # Deterministic synthetic params (shapes implied by the concrete submodule).
    params = {
        "conv1": {"w": 0.1 * jax.random.normal(k1, (3, 3, 4, 8), jnp.float32),
                  "b": 0.1 * jax.random.normal(k2, (8,), jnp.float32)},
        "conv2": {"w": 0.1 * jax.random.normal(k3, (3, 3, 8, 16), jnp.float32),
                  "b": 0.1 * jax.random.normal(k4, (16,), jnp.float32)},
    }

    x = jax.random.normal(kx, (2, 4, 16, 16), jnp.float32)  # NCHW, like torch

    outs = feature_extractor_forward(x, params)
    outs = [jax.block_until_ready(o) for o in outs]

    refs = reference_forward(x, params)
    assert len(outs) == len(EXTRACTED_LAYERS)
    # f32 pipeline vs a HIGHEST-precision reference conv; the in-kernel MXU f32
    # matmuls use a bf16-split decomposition, so agreement is ~1e-6..1e-5.
    for name, o, r in zip(EXTRACTED_LAYERS, outs, refs):
        assert o.shape == r.shape, (name, o.shape, r.shape)
        assert jnp.allclose(o, r, rtol=1e-4, atol=1e-4), (
            name, float(jnp.max(jnp.abs(o - r))))

    print("KERNEL_OK")
</pallas_src>

<mosaic_0001>
module attributes {stable_mosaic.version = 11 : i64} {
  func.func @_fused_chain_kernel(%arg0: i32, %arg1: memref<1x4x256xf32, #tpu.memory_space<vmem>>, %arg2: memref<8x36xf32, #tpu.memory_space<vmem>>, %arg3: memref<8x1xf32, #tpu.memory_space<vmem>>, %arg4: memref<16x72xf32, #tpu.memory_space<vmem>>, %arg5: memref<16x1xf32, #tpu.memory_space<vmem>>, %arg6: memref<1x8x256xf32, #tpu.memory_space<vmem>>, %arg7: memref<1x8x256xf32, #tpu.memory_space<vmem>>, %arg8: memref<1x8x64xf32, #tpu.memory_space<vmem>>, %arg9: memref<1x16x64xf32, #tpu.memory_space<vmem>>, %arg10: memref<1x16x64xf32, #tpu.memory_space<vmem>>) attributes {dimension_semantics = [#tpu.dimension_semantics<parallel>], iteration_bounds = array<i64: 2>, scalar_prefetch = 0 : i64, scratch_operands = 0 : i64, tpu.core_type = #tpu.core_type<tc>, window_params = [{transform_indices = @transform_0, window_bounds = array<i64: 1, 4, 256>}, {pipeline_mode = #tpu.pipeline_mode<synchronous>, transform_indices = @transform_1, window_bounds = array<i64: 8, 36>}, {pipeline_mode = #tpu.pipeline_mode<synchronous>, transform_indices = @transform_2, window_bounds = array<i64: 8, 1>}, {pipeline_mode = #tpu.pipeline_mode<synchronous>, transform_indices = @transform_3, window_bounds = array<i64: 16, 72>}, {pipeline_mode = #tpu.pipeline_mode<synchronous>, transform_indices = @transform_4, window_bounds = array<i64: 16, 1>}, {transform_indices = @transform_5, window_bounds = array<i64: 1, 8, 256>}, {transform_indices = @transform_6, window_bounds = array<i64: 1, 8, 256>}, {transform_indices = @transform_7, window_bounds = array<i64: 1, 8, 64>}, {transform_indices = @transform_8, window_bounds = array<i64: 1, 16, 64>}, {transform_indices = @transform_9, window_bounds = array<i64: 1, 16, 64>}]} {
    %0 = tpu.iota {dimensions = array<i32: 1>} : vector<1x256xi32>
    %c15_i32 = arith.constant 15 : i32
    %1 = vector.broadcast %c15_i32 : i32 to vector<1x256xi32>
    %2 = arith.andi %0, %1 : vector<1x256xi32>
    %c0_i32 = arith.constant 0 : i32
    %3 = vector.broadcast %c0_i32 : i32 to vector<1x256xi32>
    %4 = arith.cmpi ne, %2, %3 : vector<1x256xi32>
    %5 = arith.extui %4 : vector<1x256xi1> to vector<1x256xi32>
    %6 = arith.sitofp %5 : vector<1x256xi32> to vector<1x256xf32>
    %c15_i32_0 = arith.constant 15 : i32
    %7 = vector.broadcast %c15_i32_0 : i32 to vector<1x256xi32>
    %8 = arith.cmpi ne, %2, %7 : vector<1x256xi32>
    %9 = arith.extui %8 : vector<1x256xi1> to vector<1x256xi32>
    %10 = arith.sitofp %9 : vector<1x256xi32> to vector<1x256xf32>
    %11 = tpu.iota {dimensions = array<i32: 1>} : vector<1x64xi32>
    %c7_i32 = arith.constant 7 : i32
    %12 = vector.broadcast %c7_i32 : i32 to vector<1x64xi32>
    %13 = arith.andi %11, %12 : vector<1x64xi32>
    %c0_i32_1 = arith.constant 0 : i32
    %14 = vector.broadcast %c0_i32_1 : i32 to vector<1x64xi32>
    %15 = arith.cmpi ne, %13, %14 : vector<1x64xi32>
    %16 = arith.extui %15 : vector<1x64xi1> to vector<1x64xi32>
    %17 = arith.sitofp %16 : vector<1x64xi32> to vector<1x64xf32>
    %c7_i32_2 = arith.constant 7 : i32
    %18 = vector.broadcast %c7_i32_2 : i32 to vector<1x64xi32>
    %19 = arith.cmpi ne, %13, %18 : vector<1x64xi32>
    %20 = arith.extui %19 : vector<1x64xi1> to vector<1x64xi32>
    %21 = arith.sitofp %20 : vector<1x64xi32> to vector<1x64xf32>
    %22 = tpu.iota {dimensions = array<i32: 0>} : vector<256x64xi32>
    %23 = tpu.iota {dimensions = array<i32: 1>} : vector<256x64xi32>
    %c3_i32 = arith.constant 3 : i32
    %24 = vector.broadcast %c3_i32 : i32 to vector<256x64xi32>
    %25 = arith.shrsi %23, %24 : vector<256x64xi32>
    %c32_i32 = arith.constant 32 : i32
    %26 = vector.broadcast %c32_i32 : i32 to vector<256x64xi32>
    %27 = arith.muli %25, %26 : vector<256x64xi32>
    %c7_i32_3 = arith.constant 7 : i32
    %28 = vector.broadcast %c7_i32_3 : i32 to vector<256x64xi32>
    %29 = arith.andi %23, %28 : vector<256x64xi32>
    %c2_i32 = arith.constant 2 : i32
    %30 = vector.broadcast %c2_i32 : i32 to vector<256x64xi32>
    %31 = arith.muli %29, %30 : vector<256x64xi32>
    %32 = arith.addi %27, %31 : vector<256x64xi32>
    %33 = arith.cmpi eq, %22, %32 : vector<256x64xi32>
    %34 = arith.extui %33 : vector<256x64xi1> to vector<256x64xi32>
    %35 = arith.sitofp %34 : vector<256x64xi32> to vector<256x64xf32>
    %c0 = arith.constant 0 : index
    %c0_4 = arith.constant 0 : index
    %36 = vector.load %arg2[%c0, %c0_4] : memref<8x36xf32, #tpu.memory_space<vmem>>, vector<8x36xf32>
    %c0_5 = arith.constant 0 : index
    %c0_6 = arith.constant 0 : index
    %37 = vector.load %arg3[%c0_5, %c0_6] : memref<8x1xf32, #tpu.memory_space<vmem>>, vector<8x1xf32>
    %c0_7 = arith.constant 0 : index
    %c0_8 = arith.constant 0 : index
    %38 = vector.load %arg4[%c0_7, %c0_8] : memref<16x72xf32, #tpu.memory_space<vmem>>, vector<16x72xf32>
    %c0_9 = arith.constant 0 : index
    %c0_10 = arith.constant 0 : index
    %39 = vector.load %arg5[%c0_9, %c0_10] : memref<16x1xf32, #tpu.memory_space<vmem>>, vector<16x1xf32>
    %c0_11 = arith.constant 0 : index
    %c0_12 = arith.constant 0 : index
    %c0_13 = arith.constant 0 : index
    %40 = vector.load %arg1[%c0_11, %c0_12, %c0_13] : memref<1x4x256xf32, #tpu.memory_space<vmem>>, vector<1x4x256xf32>
    %41 = vector.shape_cast %40 : vector<1x4x256xf32> to vector<4x256xf32>
    %cst = arith.constant 0.000000e+00 : f32
    %42 = vector.broadcast %cst : f32 to vector<4x17xf32>
    %43 = tpu.concatenate %42, %41, %42 in 1 : vector<4x17xf32>, vector<4x256xf32>, vector<4x17xf32> -> vector<4x290xf32>
    %44 = vector.extract_strided_slice %43 {offsets = [0, 0], sizes = [4, 256], strides = [1, 1]} : vector<4x290xf32> to vector<4x256xf32>
    %45 = vector.broadcast %6 : vector<1x256xf32> to vector<4x256xf32>
    %46 = arith.mulf %44, %45 : vector<4x256xf32>
    %47 = vector.extract_strided_slice %43 {offsets = [0, 1], sizes = [4, 256], strides = [1, 1]} : vector<4x290xf32> to vector<4x256xf32>
    %48 = vector.extract_strided_slice %43 {offsets = [0, 2], sizes = [4, 256], strides = [1, 1]} : vector<4x290xf32> to vector<4x256xf32>
    %49 = vector.broadcast %10 : vector<1x256xf32> to vector<4x256xf32>
    %50 = arith.mulf %48, %49 : vector<4x256xf32>
    %51 = vector.extract_strided_slice %43 {offsets = [0, 16], sizes = [4, 256], strides = [1, 1]} : vector<4x290xf32> to vector<4x256xf32>
    %52 = vector.broadcast %6 : vector<1x256xf32> to vector<4x256xf32>
    %53 = arith.mulf %51, %52 : vector<4x256xf32>
    %54 = vector.extract_strided_slice %43 {offsets = [0, 17], sizes = [4, 256], strides = [1, 1]} : vector<4x290xf32> to vector<4x256xf32>
    %55 = vector.extract_strided_slice %43 {offsets = [0, 18], sizes = [4, 256], strides = [1, 1]} : vector<4x290xf32> to vector<4x256xf32>
    %56 = vector.broadcast %10 : vector<1x256xf32> to vector<4x256xf32>
    %57 = arith.mulf %55, %56 : vector<4x256xf32>
    %58 = vector.extract_strided_slice %43 {offsets = [0, 32], sizes = [4, 256], strides = [1, 1]} : vector<4x290xf32> to vector<4x256xf32>
    %59 = vector.broadcast %6 : vector<1x256xf32> to vector<4x256xf32>
    %60 = arith.mulf %58, %59 : vector<4x256xf32>
    %61 = vector.extract_strided_slice %43 {offsets = [0, 33], sizes = [4, 256], strides = [1, 1]} : vector<4x290xf32> to vector<4x256xf32>
    %62 = vector.extract_strided_slice %43 {offsets = [0, 34], sizes = [4, 256], strides = [1, 1]} : vector<4x290xf32> to vector<4x256xf32>
    %63 = vector.broadcast %10 : vector<1x256xf32> to vector<4x256xf32>
    %64 = arith.mulf %62, %63 : vector<4x256xf32>
    %65 = tpu.concatenate %46, %47, %50, %53, %54, %57, %60, %61, %64 in 0 : vector<4x256xf32>, vector<4x256xf32>, vector<4x256xf32>, vector<4x256xf32>, vector<4x256xf32>, vector<4x256xf32>, vector<4x256xf32>, vector<4x256xf32>, vector<4x256xf32> -> vector<36x256xf32>
    %cst_14 = arith.constant dense<0.000000e+00> : vector<8x256xf32>
    %66 = tpu.matmul %36, %65, %cst_14 {dimension_numbers = #tpu.dot_dimension_numbers<[1], [0], [0], [1], [0, 0, 1, 1], [], []>} : vector<8x36xf32>, vector<36x256xf32>, vector<8x256xf32> -> vector<8x256xf32>
    %67 = vector.broadcast %37 : vector<8x1xf32> to vector<8x256xf32>
    %68 = arith.addf %66, %67 : vector<8x256xf32>
    %c0_15 = arith.constant 0 : index
    %c0_16 = arith.constant 0 : index
    %c0_17 = arith.constant 0 : index
    %69 = vector.load %arg6[%c0_15, %c0_16, %c0_17] : memref<1x8x256xf32, #tpu.memory_space<vmem>>, vector<1x8x256xf32>
    %70 = vector.shape_cast %69 : vector<1x8x256xf32> to vector<8x256xf32>
    %71 = vector.shape_cast %68 : vector<8x256xf32> to vector<1x8x256xf32>
    tpu.vector_store %arg6[%c0_15, %c0_16, %c0_17], %71 {strides = array<i32>} : memref<1x8x256xf32, #tpu.memory_space<vmem>>, vector<1x8x256xf32>,
    %cst_18 = arith.constant 0.000000e+00 : f32
    %72 = vector.broadcast %cst_18 : f32 to vector<8x256xf32>
    %73 = arith.maximumf %68, %72 : vector<8x256xf32>
    %c0_19 = arith.constant 0 : index
    %c0_20 = arith.constant 0 : index
    %c0_21 = arith.constant 0 : index
    %74 = vector.load %arg7[%c0_19, %c0_20, %c0_21] : memref<1x8x256xf32, #tpu.memory_space<vmem>>, vector<1x8x256xf32>
    %75 = vector.shape_cast %74 : vector<1x8x256xf32> to vector<8x256xf32>
    %76 = vector.shape_cast %73 : vector<8x256xf32> to vector<1x8x256xf32>
    tpu.vector_store %arg7[%c0_19, %c0_20, %c0_21], %76 {strides = array<i32>} : memref<1x8x256xf32, #tpu.memory_space<vmem>>, vector<1x8x256xf32>,
    %cst_22 = arith.constant 0.000000e+00 : f32
    %77 = vector.broadcast %cst_22 : f32 to vector<8x17xf32>
    %78 = tpu.concatenate %73, %77 in 1 : vector<8x256xf32>, vector<8x17xf32> -> vector<8x273xf32>
    %79 = vector.extract_strided_slice %78 {offsets = [0, 0], sizes = [8, 256], strides = [1, 1]} : vector<8x273xf32> to vector<8x256xf32>
    %80 = vector.extract_strided_slice %78 {offsets = [0, 1], sizes = [8, 256], strides = [1, 1]} : vector<8x273xf32> to vector<8x256xf32>
    %81 = arith.maximumf %79, %80 : vector<8x256xf32>
    %82 = vector.extract_strided_slice %78 {offsets = [0, 16], sizes = [8, 256], strides = [1, 1]} : vector<8x273xf32> to vector<8x256xf32>
    %83 = vector.extract_strided_slice %78 {offsets = [0, 17], sizes = [8, 256], strides = [1, 1]} : vector<8x273xf32> to vector<8x256xf32>
    %84 = arith.maximumf %82, %83 : vector<8x256xf32>
    %85 = arith.maximumf %81, %84 : vector<8x256xf32>
    %cst_23 = arith.constant dense<0.000000e+00> : vector<8x64xf32>
    %86 = tpu.matmul %85, %35, %cst_23 {dimension_numbers = #tpu.dot_dimension_numbers<[1], [0], [0], [1], [0, 0, 1, 1], [], []>} : vector<8x256xf32>, vector<256x64xf32>, vector<8x64xf32> -> vector<8x64xf32>
    %c0_24 = arith.constant 0 : index
    %c0_25 = arith.constant 0 : index
    %c0_26 = arith.constant 0 : index
    %87 = vector.load %arg8[%c0_24, %c0_25, %c0_26] : memref<1x8x64xf32, #tpu.memory_space<vmem>>, vector<1x8x64xf32>
    %88 = vector.shape_cast %87 : vector<1x8x64xf32> to vector<8x64xf32>
    %89 = vector.shape_cast %86 : vector<8x64xf32> to vector<1x8x64xf32>
    tpu.vector_store %arg8[%c0_24, %c0_25, %c0_26], %89 {strides = array<i32>} : memref<1x8x64xf32, #tpu.memory_space<vmem>>, vector<1x8x64xf32>,
    %cst_27 = arith.constant 0.000000e+00 : f32
    %90 = vector.broadcast %cst_27 : f32 to vector<8x9xf32>
    %91 = tpu.concatenate %90, %86, %90 in 1 : vector<8x9xf32>, vector<8x64xf32>, vector<8x9xf32> -> vector<8x82xf32>
    %92 = vector.extract_strided_slice %91 {offsets = [0, 0], sizes = [8, 64], strides = [1, 1]} : vector<8x82xf32> to vector<8x64xf32>
    %93 = vector.broadcast %17 : vector<1x64xf32> to vector<8x64xf32>
    %94 = arith.mulf %92, %93 : vector<8x64xf32>
    %95 = vector.extract_strided_slice %91 {offsets = [0, 1], sizes = [8, 64], strides = [1, 1]} : vector<8x82xf32> to vector<8x64xf32>
    %96 = vector.extract_strided_slice %91 {offsets = [0, 2], sizes = [8, 64], strides = [1, 1]} : vector<8x82xf32> to vector<8x64xf32>
    %97 = vector.broadcast %21 : vector<1x64xf32> to vector<8x64xf32>
    %98 = arith.mulf %96, %97 : vector<8x64xf32>
    %99 = vector.extract_strided_slice %91 {offsets = [0, 8], sizes = [8, 64], strides = [1, 1]} : vector<8x82xf32> to vector<8x64xf32>
    %100 = vector.broadcast %17 : vector<1x64xf32> to vector<8x64xf32>
    %101 = arith.mulf %99, %100 : vector<8x64xf32>
    %102 = vector.extract_strided_slice %91 {offsets = [0, 9], sizes = [8, 64], strides = [1, 1]} : vector<8x82xf32> to vector<8x64xf32>
    %103 = vector.extract_strided_slice %91 {offsets = [0, 10], sizes = [8, 64], strides = [1, 1]} : vector<8x82xf32> to vector<8x64xf32>
    %104 = vector.broadcast %21 : vector<1x64xf32> to vector<8x64xf32>
    %105 = arith.mulf %103, %104 : vector<8x64xf32>
    %106 = vector.extract_strided_slice %91 {offsets = [0, 16], sizes = [8, 64], strides = [1, 1]} : vector<8x82xf32> to vector<8x64xf32>
    %107 = vector.broadcast %17 : vector<1x64xf32> to vector<8x64xf32>
    %108 = arith.mulf %106, %107 : vector<8x64xf32>
    %109 = vector.extract_strided_slice %91 {offsets = [0, 17], sizes = [8, 64], strides = [1, 1]} : vector<8x82xf32> to vector<8x64xf32>
    %110 = vector.extract_strided_slice %91 {offsets = [0, 18], sizes = [8, 64], strides = [1, 1]} : vector<8x82xf32> to vector<8x64xf32>
    %111 = vector.broadcast %21 : vector<1x64xf32> to vector<8x64xf32>
    %112 = arith.mulf %110, %111 : vector<8x64xf32>
    %113 = tpu.concatenate %94, %95, %98, %101, %102, %105, %108, %109, %112 in 0 : vector<8x64xf32>, vector<8x64xf32>, vector<8x64xf32>, vector<8x64xf32>, vector<8x64xf32>, vector<8x64xf32>, vector<8x64xf32>, vector<8x64xf32>, vector<8x64xf32> -> vector<72x64xf32>
    %cst_28 = arith.constant dense<0.000000e+00> : vector<16x64xf32>
    %114 = tpu.matmul %38, %113, %cst_28 {dimension_numbers = #tpu.dot_dimension_numbers<[1], [0], [0], [1], [0, 0, 1, 1], [], []>} : vector<16x72xf32>, vector<72x64xf32>, vector<16x64xf32> -> vector<16x64xf32>
    %115 = vector.broadcast %39 : vector<16x1xf32> to vector<16x64xf32>
    %116 = arith.addf %114, %115 : vector<16x64xf32>
    %c0_29 = arith.constant 0 : index
    %c0_30 = arith.constant 0 : index
    %c0_31 = arith.constant 0 : index
    %117 = vector.load %arg9[%c0_29, %c0_30, %c0_31] : memref<1x16x64xf32, #tpu.memory_space<vmem>>, vector<1x16x64xf32>
    %118 = vector.shape_cast %117 : vector<1x16x64xf32> to vector<16x64xf32>
    %119 = vector.shape_cast %116 : vector<16x64xf32> to vector<1x16x64xf32>
    tpu.vector_store %arg9[%c0_29, %c0_30, %c0_31], %119 {strides = array<i32>} : memref<1x16x64xf32, #tpu.memory_space<vmem>>, vector<1x16x64xf32>,
    %cst_32 = arith.constant 0.000000e+00 : f32
    %120 = vector.broadcast %cst_32 : f32 to vector<16x64xf32>
    %121 = arith.maximumf %116, %120 : vector<16x64xf32>
    %c0_33 = arith.constant 0 : index
    %c0_34 = arith.constant 0 : index
    %c0_35 = arith.constant 0 : index
    %122 = vector.load %arg10[%c0_33, %c0_34, %c0_35] : memref<1x16x64xf32, #tpu.memory_space<vmem>>, vector<1x16x64xf32>
    %123 = vector.shape_cast %122 : vector<1x16x64xf32> to vector<16x64xf32>
    %124 = vector.shape_cast %121 : vector<16x64xf32> to vector<1x16x64xf32>
    tpu.vector_store %arg10[%c0_33, %c0_34, %c0_35], %124 {strides = array<i32>} : memref<1x16x64xf32, #tpu.memory_space<vmem>>, vector<1x16x64xf32>,
    return
  }
  func.func @transform_0(%arg0: i32) -> (i32, i32, i32) {
    %c0_i32 = arith.constant 0 : i32
    %c0_i32_0 = arith.constant 0 : i32
    %c0_i32_1 = arith.constant 0 : i32
    return %arg0, %c0_i32, %c0_i32_0 : i32, i32, i32
  }
  func.func @transform_1(%arg0: i32) -> (i32, i32) {
    %c0_i32 = arith.constant 0 : i32
    %c0_i32_0 = arith.constant 0 : i32
    %c0_i32_1 = arith.constant 0 : i32
    return %c0_i32, %c0_i32_0 : i32, i32
  }
  func.func @transform_2(%arg0: i32) -> (i32, i32) {
    %c0_i32 = arith.constant 0 : i32
    %c0_i32_0 = arith.constant 0 : i32
    %c0_i32_1 = arith.constant 0 : i32
    return %c0_i32, %c0_i32_0 : i32, i32
  }
  func.func @transform_3(%arg0: i32) -> (i32, i32) {
    %c0_i32 = arith.constant 0 : i32
    %c0_i32_0 = arith.constant 0 : i32
    %c0_i32_1 = arith.constant 0 : i32
    return %c0_i32, %c0_i32_0 : i32, i32
  }
  func.func @transform_4(%arg0: i32) -> (i32, i32) {
    %c0_i32 = arith.constant 0 : i32
    %c0_i32_0 = arith.constant 0 : i32
    %c0_i32_1 = arith.constant 0 : i32
    return %c0_i32, %c0_i32_0 : i32, i32
  }
  func.func @transform_5(%arg0: i32) -> (i32, i32, i32) {
    %c0_i32 = arith.constant 0 : i32
    %c0_i32_0 = arith.constant 0 : i32
    %c0_i32_1 = arith.constant 0 : i32
    return %arg0, %c0_i32, %c0_i32_0 : i32, i32, i32
  }
  func.func @transform_6(%arg0: i32) -> (i32, i32, i32) {
    %c0_i32 = arith.constant 0 : i32
    %c0_i32_0 = arith.constant 0 : i32
    %c0_i32_1 = arith.constant 0 : i32
    return %arg0, %c0_i32, %c0_i32_0 : i32, i32, i32
  }
  func.func @transform_7(%arg0: i32) -> (i32, i32, i32) {
    %c0_i32 = arith.constant 0 : i32
    %c0_i32_0 = arith.constant 0 : i32
    %c0_i32_1 = arith.constant 0 : i32
    return %arg0, %c0_i32, %c0_i32_0 : i32, i32, i32
  }
  func.func @transform_8(%arg0: i32) -> (i32, i32, i32) {
    %c0_i32 = arith.constant 0 : i32
    %c0_i32_0 = arith.constant 0 : i32
    %c0_i32_1 = arith.constant 0 : i32
    return %arg0, %c0_i32, %c0_i32_0 : i32, i32, i32
  }
  func.func @transform_9(%arg0: i32) -> (i32, i32, i32) {
    %c0_i32 = arith.constant 0 : i32
    %c0_i32_0 = arith.constant 0 : i32
    %c0_i32_1 = arith.constant 0 : i32
    return %arg0, %c0_i32, %c0_i32_0 : i32, i32, i32
  }
}

</mosaic_0001>

<bundles_post_ra>
// kernel: feature_extractor_forward.1
= control target key start
LH: loop header
LB: loop body
LE: loop exit
PB: predicated region body
PF: predicated region fallthrough
CT: control target
= control target key end

     0   :  { %s1597_s30 = smov 0   ;;  %s1897_s0 = inlined_call_operand.vmem [shape: f32[2,4,256], index: 0, kind: input, shape index: {}]   ;;  %s1898_s1 = inlined_call_operand.vmem [shape: f32[8,36], index: 1, kind: input, shape index: {}]   ;;  %s1899_s2 = inlined_call_operand.vmem [shape: f32[8,1], index: 2, kind: input, shape index: {}]   ;;  %s1900_s3 = inlined_call_operand.vmem [shape: f32[16,72], index: 3, kind: input, shape index: {}]   ;;  %s1901_s4 = inlined_call_operand.vmem [shape: f32[16,1], index: 4, kind: input, shape index: {}]   ;;  %s1902_s5 = inlined_call_operand.vmem [shape: f32[2,8,256], index: 5, kind: output, shape index: {0}]   ;;  %s1903_s6 = inlined_call_operand.vmem [shape: f32[2,8,256], index: 6, kind: output, shape index: {1}]   ;;  %s1904_s7 = inlined_call_operand.vmem [shape: f32[2,8,64], index: 7, kind: output, shape index: {2}]   ;;  %s1905_s8 = inlined_call_operand.vmem [shape: f32[2,16,64], index: 8, kind: output, shape index: {3}]   ;;  %s1906_s9 = inlined_call_operand.vmem [shape: f32[2,16,64], index: 9, kind: output, shape index: {4}]  }
   0x1 LB: > { %s1282_s10 = sadd.s32 4294967295, %s1522_s30   ;;  %p1286_p0 = scmp.ge.s32.totalorder %s1522_s30, 1  ;;  %s1522_s30 = sphi %s1597_s30, %s20_s30  }
   0x2   : > { %p296_p1 = scmp.lt.s32.totalorder %s1522_s30, 3 }
   0x4   : > { %p297_p2 = pnand %p1286_p0, %p296_p1 }
   0x5   : > { %p351_p3 = scmp.lt.s32.totalorder (!%p297_p2), %s1282_s10, 1  ;;  %s1525_s15 = smov (!%p297_p2), 17  }
   0x6   : > { %300 = sbr.rel (%p297_p2) target bundleno = 1398 (0x576), region = 40  ;;  %s1526_s16 = smov (!%p297_p2), 34  }
   0x7   : > { %s1527_s17 = smov (!%p297_p2), 32   ;;  %s1528_s18 = smov (!%p297_p2), 18  }
   0x8   : > { %s1529_s19 = smov (!%p297_p2), 2   ;;  %s1530_s20 = smov (!%p297_p2), 16  }
   0x9   : > { %s1531_s21 = smov (!%p297_p2), 111   ;;  %s1532_s22 = smov (!%p297_p2), 94  }
   0xa   : > { %s1533_s23 = smov (!%p297_p2), 96   ;;  %s1534_s24 = smov (!%p297_p2), 95  }
   0xb   : > { %v380_v0 = vlaneseq  ;;  %v1524_v1 = vmov 0.0   ;;  %s1908_s10 = smov (!%p351_p3, %s1282_s10), 1  ;;  %vm550_vm4 = vcmask 138240   ;;  %s1535_s25 = smov 126   ;;  %vm615_vm5 = vcmask 277504  }
   0xc   : > { %821 = vmatprep.mubr.f32.mxu0 %v1524_v1  ;;  %s1375_s11 = sshll.u32 %s1908_s10, 3  ;;  %s1536_s26 = smov 110   ;;  %vm565_vm6 = vcmask 15360   ;;  %vm591_vm7 = vcmask 146432   ;;  %vm603_vm8 = vcmask 261120   ;;  %vm579_vm9 = vcmask 130048  }
   0xd   : > { %v1609_v2 = vand.u32 127, %v380_v0  ;;  %s355_s14 = scalar_lea.vmem %s1897_s0, %s1375_s11  ;;  %s1537_s27 = smov 112   ;;  %v1539_v61 = vmov 0   ;;  %vm732_vm10 = vcmask 769024   ;;  %vm735_vm11 = vcmask 1043456  }
   0xe   : > { %v543_v5 = vld [vmem:[%s355_s14] sm:$0xff]  ;;  %s1538_s28 = smov 127   ;;  %1514 = vset.pattern.permute.xlu0 %v1539_v61  ;;  %1503 = vset.pattern.permute.xlu1 %v1539_v61  ;;  %vm718_vm12 = vcmask 777216   ;;  %vm707_vm13 = vcmask 785408   ;;  %vm693_vm14 = vcmask 900096   ;;  %vm676_vm15 = vcmask 908288   ;;  %s369_s14 = scalar_lea.vmem %s1904_s7, %s1375_s11 }
   0xf   : > { %v382_v3 = vadd.s32 128, %v1609_v2  ;;  %v383_v4 = vand.u32 15, %v1609_v2  ;;  %546 = vrot.lane.b32.xlu0 %v543_v5, %s1525_s15  ;;  %v545_v7 = vcombine.high %v543_v5, %v543_v5  ;;  %s1541_s12 = smov 10  }
  0x11   : > { %v384_v6 = vand.u32 15, %v382_v3  ;;  %vm391_vm0 = vcmp.ne.s32.totalorder %v383_v4, 15  ;;  %vm385_vm1 = vcmp.ne.s32.totalorder %v383_v4, 0  ;;  %v538_v3 = vld [vmem:[%s1899_s2] sm:$0xff] }
  0x12   : > { %v1300_v8 = vsel %vm391_vm0, 1.0, %v1524_v1  ;;  %v1621_v9 = vsel %vm385_vm1, 1.0, %v1524_v1  ;;  %vm665_vm0 = vcmask 916480   ;;  %vm648_vm1 = vcmask 1031168  }
  0x13   : > { %vm392_vm2 = vcmp.ne.s32.totalorder %v384_v6, 15  ;;  %vm386_vm3 = vcmp.ne.s32.totalorder %v384_v6, 0  ;;  %548 = vrot.lane.b32.xlu0 %v545_v7, %s1525_s15  ;;  %s1719_s15 = sshll.u32 %s1908_s10, 4  ;;  %s1544_s10 = smov 118  }
  0x14   : > { %v1301_v10 = vsel %vm392_vm2, 1.0, %v1524_v1  ;;  %v1625_v11 = vsel %vm386_vm3, 1.0, %v1524_v1  ;;  %vm634_vm2 = vcmask 1039360   ;;  %vm749_vm3 = vcmask 293888   ;;  %s365_s29 = scalar_lea.vmem %s1903_s6, %s1719_s15 }
  0x15   : > { %v1478_v12 = vpack.i.bf16 %v1301_v10, %v1300_v8  ;;  %v1488_v13 = vpack.i.bf16 %v1625_v11, %v1621_v9 }
  0x17   : > { %1479 = vrot.lane.b32.xlu1 %v1478_v12, %s1526_s16  ;;  %1489 = vrot.lane.b32.xlu0 %v1488_v13, %s1527_s17  ;;  %s1542_s16 = smov 9   ;;  %s1546_s17 = smov 119  }
  0x1b   : > { %1484 = vrot.lane.b32.xlu1 %v1478_v12, %s1528_s18  ;;  %1499 = vrot.lane.b32.xlu0 %v1478_v12, %s1529_s19 }
  0x1f   : > { %1494 = vrot.lane.b32.xlu1 %v1488_v13, %s1530_s20 }
  0x81   : > { %v547_v14 = vpop.permute.xlu0 %546 }
  0x82   : > { %v1633_v15 = vsel %vm550_vm4, 0.0, %v547_v14 }
  0x83   : > { %670 = vrot.lane.b32.xlu0 %v1633_v15, %s1531_s21  ;;  %v625_v24 = vrot.slane %v1633_v15, 4 }
  0x85   : > { %v549_v16 = vpop.permute.xlu0 %548 }
  0x86   : > { %v1646_v27 = vsel %vm550_vm4, %v547_v14, %v549_v16  ;;  %v1649_v29 = vsel %vm550_vm4, %v549_v16, 0.0 }
  0x87   : > { %v626_v33 = vrot.slane %v1646_v27, 4  ;;  %v627_v43 = vrot.slane %v1649_v29, 4 }
  0x89   : > { %v1480_v17 = vpop.permute.xlu1 %1479  ;;  %v1490_v20 = vpop.permute.xlu0 %1489 }
  0x8a   : > { %v1481_v18 = vunpack.i.l.bf16 %v1480_v17  ;;  %v1491_v21 = vunpack.i.l.bf16 %v1490_v20  ;;  %v1482_v30 = vunpack.i.h.bf16 %v1480_v17  ;;  %v1492_v36 = vunpack.i.h.bf16 %v1490_v20 }
  0x8c   : > { %v620_v19 = vmul.f32 %v1481_v18, %v1633_v15  ;;  %v608_v22 = vmul.f32 %v1491_v21, %v1633_v15  ;;  %v622_v35 = vmul.f32 %v1482_v30, %v1649_v29  ;;  %v610_v40 = vmul.f32 %v1492_v36, %v1649_v29 }
  0x8d   : > { %v1500_v23 = vpop.permute.xlu0 %1499  ;;  %v1485_v25 = vpop.permute.xlu1 %1484  ;;  %v616_v46 = vsel %vm615_vm5, %v1481_v18, %v1482_v30  ;;  %v604_v51 = vsel %vm603_vm8, %v1491_v21, %v1492_v36 }
  0x8e   : > { %726 = vrot.lane.b32.xlu1 %v620_v19, %s1532_s22  ;;  %701 = vrot.lane.b32.xlu0 %v608_v22, %s1533_s23  ;;  %v1501_v26 = vunpack.i.l.bf16 %v1500_v23  ;;  %v1486_v28 = vunpack.i.l.bf16 %v1485_v25  ;;  %v1502_v37 = vunpack.i.h.bf16 %v1500_v23  ;;  %v1487_v44 = vunpack.i.h.bf16 %v1485_v25 }
  0x8f   : > { %v621_v48 = vmul.f32 %v616_v46, %v1646_v27  ;;  %v609_v55 = vmul.f32 %v604_v51, %v1646_v27 }
  0x90   : > { %v570_v31 = vmul.f32 %v1501_v26, %v1633_v15  ;;  %v596_v32 = vmul.f32 %v1486_v28, %v1633_v15  ;;  %v572_v41 = vmul.f32 %v1502_v37, %v1649_v29  ;;  %v566_v49 = vsel %vm565_vm6, %v1501_v26, %v1502_v37 }
  0x91   : > { %v1495_v34 = vpop.permute.xlu1 %1494  ;;  %v592_v50 = vsel %vm591_vm7, %v1486_v28, %v1487_v44  ;;  %v571_v52 = vmul.f32 %v566_v49, %v1646_v27  ;;  %v598_v54 = vmul.f32 %v1487_v44, %v1649_v29 }
  0x92   : > { %712 = vrot.lane.b32.xlu1 %v625_v24, %s1534_s24  ;;  %672 = vrot.lane.b32.xlu0 %v1646_v27, %s1531_s21  ;;  %v1496_v38 = vunpack.i.l.bf16 %v1495_v34  ;;  %v684_v39 = vrot.slane %v596_v32, 4  ;;  %v1497_v47 = vunpack.i.h.bf16 %v1495_v34  ;;  %v597_v53 = vmul.f32 %v592_v50, %v1646_v27 }
  0x93   : > { %v686_v60 = vrot.slane %v598_v54, 4 }
  0x94   : > { %v584_v42 = vmul.f32 %v1496_v38, %v1633_v15  ;;  %v580_v56 = vsel %vm579_vm9, %v1496_v38, %v1497_v47  ;;  %v685_v57 = vrot.slane %v597_v53, 4  ;;  %v586_v59 = vmul.f32 %v1497_v47, %v1649_v29 }
  0x95   : > { %v585_v58 = vmul.f32 %v580_v56, %v1646_v27  ;;  %v558_v53 = vmul.f32 %v1625_v11, %v1646_v27  ;;  %v437_v11 = vshra.s32 %v1609_v2, 3 }
  0x96   : > { %674 = vrot.lane.b32.xlu1 %v1649_v29, %s1531_s21  ;;  %642 = vrot.lane.b32.xlu0 %v570_v31, %s1535_s25  ;;  %v656_v45 = vrot.slane %v584_v42, 4  ;;  %v658_v63 = vrot.slane %v586_v59, 4  ;;  %v1715_v59 = vand.u32 7, %v1609_v2 }
  0x97   : > { %v657_v62 = vrot.slane %v585_v58, 4 }
  0x9a   : > { %714 = vrot.lane.b32.xlu1 %v626_v33, %s1534_s24  ;;  %730 = vrot.lane.b32.xlu0 %v622_v35, %s1532_s22 }
  0x9e   : > { %687 = vrot.lane.b32.xlu1 %v684_v39, %s1536_s26  ;;  %705 = vrot.lane.b32.xlu0 %v610_v40, %s1533_s23 }
  0xa2   : > { %646 = vrot.lane.b32.xlu1 %v572_v41, %s1535_s25  ;;  %716 = vrot.lane.b32.xlu0 %v627_v43, %s1534_s24 }
  0xa6   : > { %659 = vrot.lane.b32.xlu1 %v656_v45, %s1537_s27  ;;  %630 = vrot.lane.b32.xlu0 %v626_v33, %s1538_s28 }
  0xaa   : > { %728 = vrot.lane.b32.xlu1 %v621_v48, %s1532_s22  ;;  %644 = vrot.lane.b32.xlu0 %v571_v52, %s1535_s25  ;;  %s360_s22 = scalar_lea.vmem %s1902_s5, %s1719_s15 }
  0xae   : > { %703 = vrot.lane.b32.xlu1 %v609_v55, %s1533_s23  ;;  %689 = vrot.lane.b32.xlu0 %v685_v57, %s1536_s26  ;;  %v557_v55 = vmul.f32 %v1621_v9, %v1633_v15  ;;  %v537_v57 = vld [vmem:[%s1898_s1] sm:$0xff]  ;;  %v438_v9 = vmul.u32 32, %v437_v11  ;;  %v439_v15 = vmul.u32 2, %v1715_v59 }
  0xb2   : > { %691 = vrot.lane.b32.xlu1 %v686_v60, %s1536_s26  ;;  %661 = vrot.lane.b32.xlu0 %v657_v62, %s1537_s27  ;;  %v1723_v60 = vshrl.u32 %v380_v0, 7  ;;  %v1729_v62 = vadd.s32 %v439_v15, %v438_v9 }
  0xb4   : > { %v436_v0 = vadd.s32 248, %v1723_v60 }
  0xb6   : > { %663 = vrot.lane.b32.xlu1 %v658_v63, %s1537_s27  ;;  %628 = vrot.lane.b32.xlu0 %v625_v24, %s1538_s28  ;;  %vm472_vm4 = vcmp.eq.s32.totalorder %v436_v0, %v1729_v62 }
  0xba   : > { %632 = vrot.lane.b32.xlu1 %v627_v43, %s1538_s28 }
  0xbe   : > { %746 = vperm.xlu1 %1503, %v538_v3  }
  0xf5   : > { %v671_v4 = vpop.permute.xlu0 %670 }
 0x100   : > { %v727_v5 = vpop.permute.xlu1 %726  ;;  %v702_v6 = vpop.permute.xlu0 %701 }
 0x104   : > { %v713_v7 = vpop.permute.xlu1 %712  ;;  %v673_v8 = vpop.permute.xlu0 %672 }
 0x105   : > { %v677_v39 = vsel %vm676_vm15, %v671_v4, %v673_v8 }
 0x108   : > { %v675_v10 = vpop.permute.xlu1 %674  ;;  %v643_v12 = vpop.permute.xlu0 %642 }
 0x109   : > { %v678_v37 = vsel %vm676_vm15, %v673_v8, %v675_v10  ;;  %v434_v8 = vadd.s32 232, %v1723_v60 }
 0x10b   : > { %vm470_vm8 = vcmp.eq.s32.totalorder %v434_v8, %v1729_v62  ;;  %v539_v8 = vld [vmem:[%s1900_s3] sm:$0xff] }
 0x10c   : > { %v715_v13 = vpop.permute.xlu1 %714  ;;  %v731_v14 = vpop.permute.xlu0 %730 }
 0x10d   : > { %v719_v28 = vsel %vm718_vm12, %v713_v7, %v715_v13  ;;  %v419_v7 = vadd.s32 112, %v1723_v60 }
 0x10f   : > { %vm455_vm7 = vcmp.eq.s32.totalorder %v419_v7, %v1729_v62 }
 0x110   : > { %v688_v16 = vpop.permute.xlu1 %687  ;;  %v706_v17 = vpop.permute.xlu0 %705 }
 0x114   : > { %v647_v18 = vpop.permute.xlu1 %646  ;;  %v717_v19 = vpop.permute.xlu0 %716 }
 0x115   : > { %v720_v29 = vsel %vm718_vm12, %v715_v13, %v717_v19  ;;  %v433_v13 = vadd.s32 224, %v1723_v60  ;;  %v416_v19 = vadd.s32 88, %v1723_v60 }
 0x118   : > { %v660_v20 = vpop.permute.xlu1 %659  ;;  %v631_v21 = vpop.permute.xlu0 %630 }
 0x11c   : > { %v729_v22 = vpop.permute.xlu1 %728  ;;  %v645_v25 = vpop.permute.xlu0 %644 }
 0x11d   : > { %v734_v23 = vsel %vm732_vm10, %v729_v22, %v731_v14  ;;  %v733_v24 = vsel %vm732_vm10, %v727_v5, %v729_v22  ;;  %v650_v45 = vsel %vm648_vm1, %v645_v25, %v647_v18  ;;  %v649_v47 = vsel %vm648_vm1, %v643_v12, %v645_v25 }
 0x11e   : > { %1336 = vmatprep.subr.msk.mxu0 %vm735_vm11, %v734_v23  ;;  %v420_v5 = vadd.s32 120, %v1723_v60  ;;  %v418_v12 = vadd.s32 104, %v1723_v60  ;;  %v1540_v14 = vmov 1.0   ;;  %v432_v18 = vadd.s32 216, %v1723_v60 }
 0x11f   : > { %1337 = vmatpush1.msk.msra.mxu0 %vm735_vm11, %v733_v24  ;;  %1380 = vmatprep.subr.msk.mxu1 %vm472_vm4, %v1540_v14  ;;  %vm469_vm10 = vcmp.eq.s32.totalorder %v433_v13, %v1729_v62  ;;  %v430_v22 = vadd.s32 200, %v1723_v60  ;;  %v414_v23 = vadd.s32 72, %v1723_v60  ;;  %v429_v24 = vadd.s32 192, %v1723_v60  ;;  %v542_v13 = vld [vmem:[%s1901_s4 + $0x8] sm:$0xff] }
 0x120   : > { %v704_v26 = vpop.permute.xlu1 %703  ;;  %v690_v34 = vpop.permute.xlu0 %689  ;;  %vm456_vm5 = vcmp.eq.s32.totalorder %v420_v5, %v1729_v62  ;;  %vm454_vm9 = vcmp.eq.s32.totalorder %v418_v12, %v1729_v62  ;;  %vm468_vm12 = vcmp.eq.s32.totalorder %v432_v18, %v1729_v62  ;;  %v413_v25 = vadd.s32 64, %v1723_v60 }
 0x121   : > { %v708_v30 = vsel %vm707_vm13, %v702_v6, %v704_v26  ;;  %v709_v31 = vsel %vm707_vm13, %v704_v26, %v706_v17  ;;  %v694_v35 = vsel %vm693_vm14, %v688_v16, %v690_v34  ;;  %v435_v6 = vadd.s32 240, %v1723_v60  ;;  %1381 = vmatpush3.msk.msra.mxu1 %vm456_vm5, %v1540_v14 }
 0x122   : > { %v743_v32 = vsel %vm735_vm11, %v709_v31, %v720_v29  ;;  %v742_v33 = vsel %vm735_vm11, %v708_v30, %v719_v28  ;;  %v740_v42 = vsel %vm735_vm11, %v677_v39, %v694_v35  ;;  %v417_v17 = vadd.s32 96, %v1723_v60 }
 0x123   : > { %781 = vmatprep.subr.mxu0 %v743_v32  ;;  %vm471_vm6 = vcmp.eq.s32.totalorder %v435_v6, %v1729_v62  ;;  %vm452_vm13 = vcmp.eq.s32.totalorder %v416_v19, %v1729_v62  ;;  %vm466_vm1 = vcmp.eq.s32.totalorder %v430_v22, %v1729_v62  ;;  %v428_v26 = vadd.s32 184, %v1723_v60 }
 0x124   : > { %782 = vmatpush1.msra.mxu0 %v742_v33  ;;  %v692_v36 = vpop.permute.xlu1 %691  ;;  %v662_v41 = vpop.permute.xlu0 %661  ;;  %1382 = vmatprep.subr.msk.mxu1 %vm471_vm6, %v1540_v14  ;;  %v412_v28 = vadd.s32 56, %v1723_v60  ;;  %vm465_vm4 = vcmp.eq.s32.totalorder %v429_v24, %v1729_v62  ;;  %v427_v29 = vadd.s32 176, %v1723_v60  ;;  %vm449_vm5 = vcmp.eq.s32.totalorder %v413_v25, %v1729_v62  ;;  %v540_v25 = vld [vmem:[%s1900_s3 + $0x8] sm:$0xff] }
 0x125   : > { %v695_v38 = vsel %vm693_vm14, %v690_v34, %v692_v36  ;;  %v666_v43 = vsel %vm665_vm0, %v660_v20, %v662_v41  ;;  %1383 = vmatpush3.msk.msra.mxu1 %vm455_vm7, %v1540_v14  ;;  %v431_v20 = vadd.s32 208, %v1723_v60  ;;  %v411_v30 = vadd.s32 48, %v1723_v60 }
 0x126   : > { %v741_v40 = vsel %vm735_vm11, %v678_v37, %v695_v38  ;;  %v738_v50 = vsel %vm735_vm11, %v649_v47, %v666_v43  ;;  %1384 = vmatprep.subr.msk.mxu1 %vm470_vm8, %v1540_v14  ;;  %vm464_vm6 = vcmp.eq.s32.totalorder %v428_v26, %v1729_v62  ;;  %v426_v31 = vadd.s32 168, %v1723_v60 }
 0x127   : > { %783 = vmatprep.subr.mxu0 %v741_v40  ;;  %1385 = vmatpush3.msk.msra.mxu1 %vm454_vm9, %v1540_v14  ;;  %vm467_vm14 = vcmp.eq.s32.totalorder %v431_v20, %v1729_v62  ;;  %vm448_vm7 = vcmp.eq.s32.totalorder %v412_v28, %v1729_v62  ;;  %v410_v32 = vadd.s32 40, %v1723_v60  ;;  %vm463_vm8 = vcmp.eq.s32.totalorder %v427_v29, %v1729_v62 }
 0x128   : > { %784 = vmatpush1.msra.mxu0 %v740_v42  ;;  %v664_v44 = vpop.permute.xlu1 %663  ;;  %v629_v49 = vpop.permute.xlu0 %628  ;;  %1386 = vmatprep.subr.msk.mxu1 %vm469_vm10, %v1540_v14  ;;  %v425_v33 = vadd.s32 160, %v1723_v60  ;;  %vm447_vm9 = vcmp.eq.s32.totalorder %v411_v30, %v1729_v62  ;;  %v409_v34 = vadd.s32 32, %v1723_v60  ;;  %vm462_vm10 = vcmp.eq.s32.totalorder %v426_v31, %v1729_v62 }
 0x129   : > { %v667_v46 = vsel %vm665_vm0, %v662_v41, %v664_v44  ;;  %v635_v51 = vsel %vm634_vm2, %v629_v49, %v631_v21  ;;  %v424_v35 = vadd.s32 152, %v1723_v60  ;;  %v408_v36 = vadd.s32 24, %v1723_v60 }
 0x12a   : > { %v739_v48 = vsel %vm735_vm11, %v650_v45, %v667_v46  ;;  %v736_v58 = vsel %vm735_vm11, %v557_v55, %v635_v51  ;;  %v423_v37 = vadd.s32 144, %v1723_v60  ;;  %v407_v38 = vadd.s32 16, %v1723_v60 }
 0x12b   : > { %785 = vmatprep.subr.mxu0 %v739_v48  ;;  %v422_v39 = vadd.s32 136, %v1723_v60  ;;  %v406_v40 = vadd.s32 8, %v1723_v60  ;;  %v421_v41 = vadd.s32 128, %v1723_v60 }
 0x12c   : > { %786 = vmatpush1.msra.mxu0 %v738_v50  ;;  %v633_v52 = vpop.permute.xlu1 %632 }
 0x12d   : > { %v636_v54 = vsel %vm634_vm2, %v631_v21, %v633_v52  ;;  %v415_v21 = vadd.s32 80, %v1723_v60 }
 0x12e   : > { %v737_v56 = vsel %vm735_vm11, %v558_v53, %v636_v54  ;;  %vm453_vm11 = vcmp.eq.s32.totalorder %v417_v17, %v1729_v62 }
 0x12f   : > { %787 = vmatprep.subr.mxu0 %v737_v56  ;;  %1387 = vmatpush3.msk.msra.mxu1 %vm453_vm11, %v1540_v14  ;;  %vm451_vm15 = vcmp.eq.s32.totalorder %v415_v21, %v1729_v62  ;;  %vm446_vm11 = vcmp.eq.s32.totalorder %v410_v32, %v1729_v62 }
 0x130   : > { %788 = vmatpush1.msra.mxu0 %v736_v58  ;;  %1388 = vmatprep.subr.msk.mxu1 %vm468_vm12, %v1540_v14  ;;  %vm461_vm12 = vcmp.eq.s32.totalorder %v425_v33, %v1729_v62 }
 0x131   : > { %1338 = vmatmul.mubr.msk.f32.vlgmr.msra.gmra.mxu0 %vm749_vm3, %v537_v57  ;;  %1389 = vmatpush3.msk.msra.mxu1 %vm452_vm13, %v1540_v14  ;;  %vm450_vm3 = vcmp.eq.s32.totalorder %v414_v23, %v1729_v62  ;;  %vm445_vm13 = vcmp.eq.s32.totalorder %v409_v34, %v1729_v62 }
 0x132   : > { %1390 = vmatprep.subr.msk.mxu1 %vm467_vm14, %v1540_v14  ;;  %vm460_vm14 = vcmp.eq.s32.totalorder %v424_v35, %v1729_v62 }
 0x133   : > { %1391 = vmatpush3.msk.msra.mxu1 %vm451_vm15, %v1540_v14  ;;  %vm444_vm15 = vcmp.eq.s32.totalorder %v408_v36, %v1729_v62 }
 0x134   : > { %1392 = vmatprep.subr.msk.mxu1 %vm466_vm1, %v1540_v14  ;;  %vm459_vm1 = vcmp.eq.s32.totalorder %v423_v37, %v1729_v62 }
 0x135   : > { %1393 = vmatpush3.msk.msra.mxu1 %vm450_vm3, %v1540_v14  ;;  %vm443_vm3 = vcmp.eq.s32.totalorder %v407_v38, %v1729_v62 }
 0x136   : > { %1394 = vmatprep.subr.msk.mxu1 %vm465_vm4, %v1540_v14  ;;  %vm458_vm4 = vcmp.eq.s32.totalorder %v422_v39, %v1729_v62 }
 0x137   : > { %1395 = vmatpush3.msk.msra.mxu1 %vm449_vm5, %v1540_v14  ;;  %vm442_vm5 = vcmp.eq.s32.totalorder %v406_v40, %v1729_v62 }
 0x138   : > { %1396 = vmatprep.subr.msk.mxu1 %vm464_vm6, %v1540_v14  ;;  %vm457_vm6 = vcmp.eq.s32.totalorder %v421_v41, %v1729_v62 }
 0x139   : > { %v747_v27 = vpop.permute.xlu1 %746  ;;  %1397 = vmatpush3.msk.msra.mxu1 %vm448_vm7, %v1540_v14  ;;  %vm441_vm7 = vcmp.eq.s32.totalorder %v1723_v60, %v1729_v62 }
 0x13a   : > { %1398 = vmatprep.subr.msk.mxu1 %vm463_vm8, %v1540_v14  ;;  %vm401_vm8 = vcmp.ne.s32.totalorder %v1715_v59, 7 }
 0x13b   : > { %1399 = vmatpush3.msk.msra.mxu1 %vm447_vm9, %v1540_v14  ;;  %v1303_v52 = vsel %vm401_vm8, 1.0, %v1524_v1  ;;  %vm398_vm9 = vcmp.ne.s32.totalorder %v1715_v59, 0 }
 0x13c   : > { %1400 = vmatprep.subr.msk.mxu1 %vm462_vm10, %v1540_v14  ;;  %vm944_vm10 = vcmask 596992  }
 0x13d   : > { %1401 = vmatpush3.msk.msra.mxu1 %vm446_vm11, %v1540_v14  ;;  %vm1009_vm11 = vcmask 588800  }
 0x13e   : > { %1402 = vmatprep.subr.msk.mxu1 %vm461_vm12, %v1540_v14  ;;  %1444 = vmatprep.mubr.msk.f32.mxu0 %vm1009_vm11, %v539_v8 }
 0x13f   : > { %1403 = vmatpush3.msk.msra.mxu1 %vm445_vm13, %v1540_v14 }
 0x140   : > { %1404 = vmatprep.subr.msk.mxu1 %vm460_vm14, %v1540_v14 }
 0x141   : > { %1405 = vmatpush3.msk.msra.mxu1 %vm444_vm15, %v1540_v14 }
 0x142   : > { %1406 = vmatprep.subr.msk.mxu1 %vm459_vm1, %v1540_v14 }
 0x143   : > { %1407 = vmatpush3.msk.msra.mxu1 %vm443_vm3, %v1540_v14 }
 0x144   : > { %1408 = vmatprep.subr.msk.mxu1 %vm458_vm4, %v1540_v14 }
 0x145   : > { %1409 = vmatpush3.msk.msra.mxu1 %vm442_vm5, %v1540_v14 }
 0x146   : > { %1410 = vmatprep.subr.msk.mxu1 %vm457_vm6, %v1540_v14 }
 0x147   : > { %1411 = vmatpush3.msk.msra.mxu1 %vm441_vm7, %v1540_v14  ;;  %v541_v14 = vld [vmem:[%s1901_s4] sm:$0xff] }
 0x1f1   : > { %v823_v61 = vpop.f32.mrf.mxu0 }
 0x1f2   : > { %v824_v63 = vadd.f32 %v823_v61, %v747_v27  ;;  %v1302_v61 = vsel %vm398_vm9, 1.0, %v1524_v1 }
 0x1f3   : > { %v825_v2 = vpop.f32.mrf.mxu0 }
 0x1f4   : > { %v1735_v3 = vmax.f32 %v824_v63, 0.0  ;;  %v826_v4 = vadd.f32 %v825_v2, %v747_v27  ;;  %828 = vst [vmem:[%s360_s22] sm:$0xff] %v824_v63 }
 0x1f6   : > { %829 = vst [vmem:[%s360_s22 + $0x8] sm:$0xff] %v826_v4  ;;  %v1742_v10 = vmax.f32 %v826_v4, 0.0  ;;  %832 = vst [vmem:[%s365_s29] sm:$0xff] %v1735_v3  ;;  %837 = vrot.lane.b32.xlu1 %v1735_v3, %s1538_s28 }
 0x1f8   : > { %833 = vst [vmem:[%s365_s29 + $0x8] sm:$0xff] %v1742_v10  ;;  %v1504_v16 = vpack.i.bf16 %v1524_v1, %v1742_v10 }
 0x1fa   : > { %1505 = vrot.lane.b32.xlu0 %v1504_v16, %s1538_s28 }
 0x268   : > { %v838_v45 = vpop.permute.xlu1 %837 }
 0x26c   : > { %v1506_v42 = vpop.permute.xlu0 %1505 }
 0x26d   : > { %v1508_v43 = vunpack.i.h.bf16 %v1506_v42  ;;  %v1507_v44 = vunpack.i.l.bf16 %v1506_v42 }
 0x26f   : > { %v850_v46 = vmax.f32 %v1508_v43, 0.0  ;;  %v844_v47 = vsel %vm634_vm2, %v1507_v44, %v1508_v43  ;;  %v843_v48 = vsel %vm634_vm2, %v838_v45, %v1507_v44  ;;  %vm936_vm2 = vcmask 523264  }
 0x270   : > { %v847_v49 = vmax.f32 %v1735_v3, %v843_v48  ;;  %v848_v50 = vmax.f32 %v1742_v10, %v844_v47 }
 0x272   : > { %854 = vrot.lane.b32.xlu1 %v847_v49, %s1537_s27  ;;  %v1509_v51 = vpack.i.bf16 %v850_v46, %v848_v50 }
 0x274   : > { %1510 = vrot.lane.b32.xlu0 %v1509_v51, %s1537_s27 }
 0x276   : > { %965 = vrot.lane.b32.xlu1 %v1303_v52, %s1528_s18 }
 0x27a   : > { %957 = vrot.lane.b32.xlu1 %v1303_v52, %s1541_s12  ;;  %s374_s12 = scalar_lea.vmem %s1905_s8, %s1719_s15 }
 0x27e   : > { %948 = vrot.lane.b32.xlu1 %v1303_v52, %s1529_s19  ;;  %s1543_s19 = smov 8  }
 0x2e4   : > { %v855_v56 = vpop.permute.xlu1 %854 }
 0x2e6   : > { %v1511_v53 = vpop.permute.xlu0 %1510 }
 0x2e7   : > { %v1513_v54 = vunpack.i.h.bf16 %v1511_v53  ;;  %v1512_v55 = vunpack.i.l.bf16 %v1511_v53 }
 0x2e8   : > { %v966_v62 = vpop.permute.xlu1 %965 }
 0x2e9   : > { %v861_v57 = vsel %vm665_vm0, %v1512_v55, %v1513_v54  ;;  %v860_v58 = vsel %vm665_vm0, %v855_v56, %v1512_v55  ;;  %vm942_vm0 = vcmask 72704  }
 0x2ea   : > { %v865_v11 = vmax.f32 %v848_v50, %v861_v57  ;;  %v864_v9 = vmax.f32 %v847_v49, %v860_v58 }
 0x2ec   : > { %930 = vmatprep.mubr.f32.mxu1 %v865_v11  ;;  %v958_v59 = vpop.permute.xlu1 %957 }
 0x2ed   : > { %931 = vmatmul.mubr.f32.vlgmr.msra.gmra.mxu1 %v864_v9 }
 0x2f0   : > { %v949_v10 = vpop.permute.xlu1 %948 }
 0x3ad   : > { %v1412_v15 = vpop.f32.mrf.mxu1 }
 0x3af   : > { %v1413_v27 = vpop.f32.mrf.mxu1 }
 0x3b0   : > { %v1414_v60 = vadd.f32 %v1413_v27, %v1412_v15 }
 0x3b2   : > { %937 = vst.msk [vmem:[%s369_s14] sm:$0xff] %vm936_vm2, %v1414_v60  ;;  %939 = vrot.lane.b32.xlu0 %v1414_v60, %s1542_s16  ;;  %s379_s14 = scalar_lea.vmem %s1906_s9, %s1719_s15 }
 0x3b6   : > { %961 = vrot.lane.b32.xlu0 %v1302_v61, %s1530_s20 }
 0x3ba   : > { %953 = vrot.lane.b32.xlu0 %v1302_v61, %s1543_s19 }
 0x424   : > { %v940_v63 = vpop.permute.xlu0 %939 }
 0x425   : > { %v943_v2 = vsel %vm942_vm0, 0.0, %v940_v63 }
 0x426   : > { %v945_v3 = vsel %vm944_vm10, %v943_v2, 0.0 }
 0x427   : > { %992 = vrot.lane.b32.xlu1 %v945_v3, %s1531_s21  ;;  %v968_v4 = vmul.f32 %v966_v62, %v945_v3  ;;  %v960_v5 = vmul.f32 %v958_v59, %v945_v3  ;;  %s1545_s21 = smov 120   ;;  %v951_v12 = vmul.f32 %v949_v10, %v945_v3  ;;  %v946_v24 = vmul.f32 %v1302_v61, %v945_v3 }
 0x428   : > { %v962_v0 = vpop.permute.xlu0 %961 }
 0x429   : > { %996 = vrot.lane.b32.xlu0 %v968_v4, %s1536_s26  ;;  %v964_v6 = vmul.f32 %v962_v0, %v945_v3 }
 0x42b   : > { %985 = vrot.lane.b32.xlu1 %v960_v5, %s1544_s10 }
 0x42c   : > { %v954_v1 = vpop.permute.xlu0 %953 }
 0x42d   : > { %v956_v7 = vmul.f32 %v954_v1, %v945_v3  ;;  %989 = vrot.lane.b32.xlu0 %v964_v6, %s1537_s27 }
 0x42f   : > { %978 = vrot.lane.b32.xlu1 %v956_v7, %s1545_s21 }
 0x431   : > { %981 = vrot.lane.b32.xlu0 %v945_v3, %s1546_s17 }
 0x433   : > { %970 = vrot.lane.b32.xlu1 %v945_v3, %s1538_s28 }
 0x435   : > { %974 = vrot.lane.b32.xlu0 %v951_v12, %s1535_s25 }
 0x437   : > { %1006 = vperm.xlu1 %1503, %v542_v13  }
 0x439   : > { %1001 = vperm.xlu0 %1514, %v541_v14  }
 0x499   : > { %v993_v16 = vpop.permute.xlu1 %992 }
 0x49b   : > { %v997_v17 = vpop.permute.xlu0 %996 }
 0x49c   : > { %1426 = vmatprep.subr.mxu0 %v997_v17 }
 0x49d   : > { %1427 = vmatpush3.msra.mxu0 %v997_v17  ;;  %v986_v18 = vpop.permute.xlu1 %985 }
 0x49e   : > { %1428 = vmatprep.subr.mxu0 %v993_v16 }
 0x49f   : > { %v990_v19 = vpop.permute.xlu0 %989  ;;  %1429 = vmatpush3.msra.mxu0 %v993_v16 }
 0x4a0   : > { %1430 = vmatprep.subr.mxu0 %v990_v19 }
 0x4a1   : > { %1431 = vmatpush3.msra.mxu0 %v990_v19  ;;  %v979_v20 = vpop.permute.xlu1 %978 }
 0x4a2   : > { %1432 = vmatprep.subr.mxu0 %v986_v18 }
 0x4a3   : > { %v982_v21 = vpop.permute.xlu0 %981  ;;  %1433 = vmatpush3.msra.mxu0 %v986_v18 }
 0x4a4   : > { %1434 = vmatprep.subr.mxu0 %v982_v21 }
 0x4a5   : > { %1435 = vmatpush3.msra.mxu0 %v982_v21  ;;  %v971_v23 = vpop.permute.xlu1 %970 }
 0x4a6   : > { %1436 = vmatprep.subr.mxu0 %v979_v20 }
 0x4a7   : > { %v975_v22 = vpop.permute.xlu0 %974  ;;  %1437 = vmatpush3.msra.mxu0 %v979_v20 }
 0x4a8   : > { %1438 = vmatprep.subr.mxu0 %v975_v22 }
 0x4a9   : > { %1439 = vmatpush3.msra.mxu0 %v975_v22 }
 0x4aa   : > { %1440 = vmatprep.subr.mxu0 %v971_v23 }
 0x4ab   : > { %1441 = vmatpush3.msra.mxu0 %v971_v23 }
 0x4ac   : > { %1442 = vmatprep.subr.mxu0 %v946_v24 }
 0x4ad   : > { %1443 = vmatpush3.msra.mxu0 %v946_v24 }
 0x4ae   : > { %1445 = vmatmul.mubr.msk.f32.vlgmr.msra.gmra.mxu0 %vm1009_vm11, %v540_v25 }
 0x4b2   : > { %v1007_v26 = vpop.permute.xlu1 %1006 }
 0x4b4   : > { %v1002_v29 = vpop.permute.xlu0 %1001 }
 0x56e   : > { %v1446_v28 = vpop.f32.mrf.mxu0 }
 0x56f   : > { %v1088_v30 = vadd.f32 %v1446_v28, %v1007_v26 }
 0x570   : > { %v1082_v31 = vpop.f32.mrf.mxu0 }
 0x571   : > { %1092 = vst.msk [vmem:[%s374_s12 + $0x8] sm:$0xff] %vm936_vm2, %v1088_v30  ;;  %v1094_v32 = vmax.f32 %v1088_v30, 0.0  ;;  %v1083_v33 = vadd.f32 %v1082_v31, %v1002_v29 }
 0x573   : > { %1096 = vst.msk [vmem:[%s379_s14 + $0x8] sm:$0xff] %vm936_vm2, %v1094_v32  ;;  %1091 = vst.msk [vmem:[%s374_s12] sm:$0xff] %vm936_vm2, %v1083_v33  ;;  %v1093_v34 = vmax.f32 %v1083_v33, 0.0 }
 0x575   : > { %1095 = vst.msk [vmem:[%s379_s14] sm:$0xff] %vm936_vm2, %v1093_v34 }
 0x576 PF: > { %s20_s30 = sadd.s32 1, %s1522_s30  }
 0x577   : > { %p17_p4 = scmp.ge.s32.totalorder %s20_s30, 4  }
 0x579   :  { %19 = sbr.rel (!%p17_p4) target bundleno = 1 (0x1), region = 118 }

</bundles_post_ra>
